<compile_context>
chip_gen: v7x
topology: tpu7x:2x2x1
jax: 0.10.0
libtpu: 0.0.40
codegen_flags: <defaults>
</compile_context>

<pallas_src>
import jax
import jax.numpy as jnp
from jax.experimental import pallas as pl
from jax.experimental.pallas import tpu as pltpu


def _round_up(v, m):
    return (v + m - 1) // m * m


# -----------------------------------------------------------------------------
# Pallas kernel: fused  relu(fc2_folded(relu(fc1_folded(x))))  for one M tile
# (BN + linear bias pre-folded into weights/bias, eval mode)
# -----------------------------------------------------------------------------

def _mlp2_kernel(x_ref, w1_ref, b1_ref, w2_ref, b2_ref, o_ref):
    # Layer 1: cast activations to bf16 in-kernel (no wrapper pad/cast pass),
    # MXU matmul with f32 accumulation; BN scale already folded into W1, so
    # the epilogue is just bias-add + ReLU on the VPU.
    x = x_ref[...].astype(jnp.bfloat16)
    h = jnp.dot(x, w1_ref[...], preferred_element_type=jnp.float32)
    h = jnp.maximum(h + b1_ref[...], 0.0)

    # Layer 2: intermediate never leaves VMEM/vregs; re-cast to bf16 for MXU.
    y = jnp.dot(h.astype(jnp.bfloat16), w2_ref[...],
                preferred_element_type=jnp.float32)
    y = jnp.maximum(y + b2_ref[...], 0.0)

    o_ref[...] = y.astype(o_ref.dtype)


# -----------------------------------------------------------------------------
# VMEM budget (derived, not hard-coded): floor at the 32 MiB default, cap at
# 48 MiB so there is headroom below v7x's 64 MiB physical VMEM per TensorCore.
# -----------------------------------------------------------------------------

def _vmem_limit_bytes(tm, nf, Kp, weight_bufs):
    bytes_w = (nf * Kp + Kp * Kp) * 2 * weight_bufs   # bf16 weights
    bytes_b = 2 * Kp * 4 * weight_bufs                # f32 folded biases
    bytes_x = 2 * tm * nf * 4                         # double-buffered f32 x tiles
    bytes_o = 2 * tm * Kp * 2                         # double-buffered bf16 out tiles
    bytes_h = 2 * tm * Kp * 4                         # f32 intermediates (h, y)
    need = bytes_w + bytes_b + bytes_x + bytes_o + bytes_h
    return int(min(max(2 * need, 32 * 1024 * 1024), 48 * 1024 * 1024))


# -----------------------------------------------------------------------------
# Wrapper
# -----------------------------------------------------------------------------

def mlp2_forward(params, x, *, out_dtype=jnp.bfloat16):
    """x: [M, nf] f32 -> [M, nf] (fc1 -> BN -> ReLU -> fc2 -> BN -> ReLU)."""
    M, nf = x.shape
    Kp = params["w2"].shape[0]          # lane-padded feature dim (multiple of 128)
    assert params["w1"].shape == (nf, Kp)

    # Tail-aware M tile: split M as evenly as possible into <=max_tm chunks,
    # rounded to 16 (bf16 sublane packing).  At Kp<=512 the x/out tiles are
    # tiny, so a larger cap amortizes the ~0.35 us per-grid-step overhead.
    # (For v7x megacore, M > max_tm automatically yields >=2 parallel tiles.)
    max_tm = 512 if Kp <= 512 else 256
    n_tiles = pl.cdiv(M, max_tm)
    tm = min(max_tm, _round_up(pl.cdiv(M, n_tiles), 16))
    grid_m = pl.cdiv(M, tm)

    # Grid-invariant operands: single-buffer them once the second pipeline
    # buffer would waste meaningful VMEM (pure waste — their block index never
    # changes).  At Kp=128 it is irrelevant, so keep the default there.
    single_buffer_weights = Kp >= 512
    weight_bufs = 1 if single_buffer_weights else 2

    def _inv_spec(shape):
        if single_buffer_weights:
            return pl.BlockSpec(shape, lambda i: (0, 0),
                                pipeline_mode=pl.Buffered(1))
        return pl.BlockSpec(shape, lambda i: (0, 0))

    out = pl.pallas_call(
        _mlp2_kernel,
        out_shape=jax.ShapeDtypeStruct((M, Kp), out_dtype),
        grid_spec=pltpu.PrefetchScalarGridSpec(
            num_scalar_prefetch=0,
            grid=(grid_m,),
            in_specs=[
                pl.BlockSpec((tm, nf), lambda i: (i, 0)),   # x tile (f32, un-padded)
                _inv_spec((nf, Kp)),                        # W1 folded (bf16)
                _inv_spec((1, Kp)),                         # bias1 folded (f32)
                _inv_spec((Kp, Kp)),                        # W2 folded (bf16)
                _inv_spec((1, Kp)),                         # bias2 folded (f32)
            ],
            out_specs=pl.BlockSpec((tm, Kp), lambda i: (i, 0)),
        ),
        compiler_params=pltpu.CompilerParams(
            dimension_semantics=("parallel",),
            vmem_limit_bytes=_vmem_limit_bytes(tm, nf, Kp, weight_bufs),
        ),
    )(x, params["w1"], params["b1"], params["w2"], params["b2"])

    # Trim lane padding only; consumers that accept the (M, Kp) lane-dense
    # layout can skip this slice entirely.
    return out[:, :nf]


# -----------------------------------------------------------------------------
# Parameters (synthetic, deterministic) + BN folding / padding (done once)
# -----------------------------------------------------------------------------

def make_raw_params(key, nf):
    """PyTorch-layout params: Linear weight [out, in] + bias, BN stats."""
    def layer(k):
        k1, k2, k3, k4, k5, k6 = jax.random.split(k, 6)
        w = jax.random.normal(k1, (nf, nf), jnp.float32) / jnp.sqrt(nf)
        b = jax.random.normal(k2, (nf,), jnp.float32) * 0.05
        gamma = jax.random.uniform(k3, (nf,), jnp.float32, minval=0.8, maxval=1.2)
        beta = jax.random.normal(k4, (nf,), jnp.float32) * 0.05
        mean = jax.random.normal(k5, (nf,), jnp.float32) * 0.05
        var = jax.random.uniform(k6, (nf,), jnp.float32, minval=0.8, maxval=1.2)
        return {"w": w, "b": b, "gamma": gamma, "beta": beta,
                "mean": mean, "var": var}

    k1, k2 = jax.random.split(key)
    return {"fc1": layer(k1), "fc2": layer(k2)}


def fold_params(raw, nf, eps=1e-5):
    """Fold Linear bias + eval-mode BN (scale INTO weight columns, in f32)
    and pre-pad the output/lane dim to a multiple of 128, once."""
    Kp = _round_up(nf, 128)
    pad_out = Kp - nf

    def fold(p, pad_in):
        scale = p["gamma"] / jnp.sqrt(p["var"] + eps)        # [out]
        bias = p["beta"] + scale * (p["b"] - p["mean"])      # [out]
        w = p["w"].T * scale[None, :]                        # [in, out], f32 fold
        w = jnp.pad(w, ((0, pad_in), (0, pad_out))).astype(jnp.bfloat16)
        b = jnp.pad(bias, (0, pad_out)).reshape(1, Kp)       # f32
        return w, b

    w1, b1 = fold(raw["fc1"], 0)        # [nf, Kp]: x is never K-padded
    w2, b2 = fold(raw["fc2"], pad_out)  # [Kp, Kp]: padded rows are zero
    return {"w1": w1, "b1": b1, "w2": w2, "b2": b2}


# -----------------------------------------------------------------------------
# Pure-JAX reference (eval-mode BN), f32 end-to-end
# -----------------------------------------------------------------------------

def mlp2_reference(raw, x, eps=1e-5):
    def layer(v, p):
        y = v @ p["w"].T + p["b"]
        y = p["gamma"] * (y - p["mean"]) / jnp.sqrt(p["var"] + eps) + p["beta"]
        return jnp.maximum(y, 0.0)

    return layer(layer(x, raw["fc1"]), raw["fc2"])


# -----------------------------------------------------------------------------
# Main
# -----------------------------------------------------------------------------

if __name__ == "__main__":
    root = jax.random.PRNGKey(0)
    pkey, xkey = jax.random.split(root)

    batch, n_feature = 16, 32
    raw_params = make_raw_params(pkey, n_feature)
    params = fold_params(raw_params, n_feature)

    x = jax.random.normal(xkey, (batch, n_feature), jnp.float32)

    fwd = jax.jit(mlp2_forward)
    out = jax.block_until_ready(fwd(params, x))

    assert out.shape == (batch, n_feature), out.shape
    out_f32 = out.astype(jnp.float32)
    assert bool(jnp.all(jnp.isfinite(out_f32)))

    ref = mlp2_reference(raw_params, x)
    max_err = float(jnp.max(jnp.abs(out_f32 - ref)))
    # bf16 MXU operands + bf16 output vs f32 reference -> small rounding diffs.
    assert max_err < 1e-1, max_err

    print("KERNEL_OK")
</pallas_src>

<mosaic_0001>
module attributes {stable_mosaic.version = 11 : i64} {
  func.func @_mlp2_kernel(%arg0: i32, %arg1: memref<16x32xf32, #tpu.memory_space<vmem>>, %arg2: memref<32x128xbf16, #tpu.memory_space<vmem>>, %arg3: memref<1x128xf32, #tpu.memory_space<vmem>>, %arg4: memref<128x128xbf16, #tpu.memory_space<vmem>>, %arg5: memref<1x128xf32, #tpu.memory_space<vmem>>, %arg6: memref<16x128xbf16, #tpu.memory_space<vmem>>) attributes {dimension_semantics = [#tpu.dimension_semantics<parallel>], iteration_bounds = array<i64: 1>, scalar_prefetch = 0 : i64, scratch_operands = 0 : i64, tpu.core_type = #tpu.core_type<tc>, window_params = [{transform_indices = @transform_0, window_bounds = array<i64: 16, 32>}, {pipeline_mode = #tpu.pipeline_mode<synchronous>, transform_indices = @transform_1, window_bounds = array<i64: 32, 128>}, {pipeline_mode = #tpu.pipeline_mode<synchronous>, transform_indices = @transform_2, window_bounds = array<i64: 1, 128>}, {pipeline_mode = #tpu.pipeline_mode<synchronous>, transform_indices = @transform_3, window_bounds = array<i64: 128, 128>}, {pipeline_mode = #tpu.pipeline_mode<synchronous>, transform_indices = @transform_4, window_bounds = array<i64: 1, 128>}, {transform_indices = @transform_5, window_bounds = array<i64: 16, 128>}]} {
    %c0 = arith.constant 0 : index
    %c0_0 = arith.constant 0 : index
    %0 = vector.load %arg1[%c0, %c0_0] : memref<16x32xf32, #tpu.memory_space<vmem>>, vector<16x32xf32>
    %1 = arith.truncf %0 : vector<16x32xf32> to vector<16x32xbf16>
    %c0_1 = arith.constant 0 : index
    %c0_2 = arith.constant 0 : index
    %2 = vector.load %arg2[%c0_1, %c0_2] : memref<32x128xbf16, #tpu.memory_space<vmem>>, vector<32x128xbf16>
    %cst = arith.constant dense<0.000000e+00> : vector<16x128xf32>
    %3 = tpu.matmul %1, %2, %cst {dimension_numbers = #tpu.dot_dimension_numbers<[1], [0], [0], [1], [0, 0, 1, 1], [], []>} : vector<16x32xbf16>, vector<32x128xbf16>, vector<16x128xf32> -> vector<16x128xf32>
    %c0_3 = arith.constant 0 : index
    %c0_4 = arith.constant 0 : index
    %4 = vector.load %arg3[%c0_3, %c0_4] : memref<1x128xf32, #tpu.memory_space<vmem>>, vector<1x128xf32>
    %5 = vector.broadcast %4 : vector<1x128xf32> to vector<16x128xf32>
    %6 = arith.addf %3, %5 : vector<16x128xf32>
    %cst_5 = arith.constant 0.000000e+00 : f32
    %7 = vector.broadcast %cst_5 : f32 to vector<16x128xf32>
    %8 = arith.maximumf %6, %7 : vector<16x128xf32>
    %9 = arith.truncf %8 : vector<16x128xf32> to vector<16x128xbf16>
    %c0_6 = arith.constant 0 : index
    %c0_7 = arith.constant 0 : index
    %10 = vector.load %arg4[%c0_6, %c0_7] : memref<128x128xbf16, #tpu.memory_space<vmem>>, vector<128x128xbf16>
    %cst_8 = arith.constant dense<0.000000e+00> : vector<16x128xf32>
    %11 = tpu.matmul %9, %10, %cst_8 {dimension_numbers = #tpu.dot_dimension_numbers<[1], [0], [0], [1], [0, 0, 1, 1], [], []>} : vector<16x128xbf16>, vector<128x128xbf16>, vector<16x128xf32> -> vector<16x128xf32>
    %c0_9 = arith.constant 0 : index
    %c0_10 = arith.constant 0 : index
    %12 = vector.load %arg5[%c0_9, %c0_10] : memref<1x128xf32, #tpu.memory_space<vmem>>, vector<1x128xf32>
    %13 = vector.broadcast %12 : vector<1x128xf32> to vector<16x128xf32>
    %14 = arith.addf %11, %13 : vector<16x128xf32>
    %cst_11 = arith.constant 0.000000e+00 : f32
    %15 = vector.broadcast %cst_11 : f32 to vector<16x128xf32>
    %16 = arith.maximumf %14, %15 : vector<16x128xf32>
    %17 = arith.truncf %16 : vector<16x128xf32> to vector<16x128xbf16>
    %c0_12 = arith.constant 0 : index
    %c0_13 = arith.constant 0 : index
    %18 = vector.load %arg6[%c0_12, %c0_13] : memref<16x128xbf16, #tpu.memory_space<vmem>>, vector<16x128xbf16>
    tpu.vector_store %arg6[%c0_12, %c0_13], %17 {strides = array<i32>} : memref<16x128xbf16, #tpu.memory_space<vmem>>, vector<16x128xbf16>,
    return
  }
  func.func @transform_0(%arg0: i32) -> (i32, i32) {
    %c0_i32 = arith.constant 0 : i32
    %c0_i32_0 = arith.constant 0 : i32
    return %arg0, %c0_i32 : i32, i32
  }
  func.func @transform_1(%arg0: i32) -> (i32, i32) {
    %c0_i32 = arith.constant 0 : i32
    %c0_i32_0 = arith.constant 0 : i32
    %c0_i32_1 = arith.constant 0 : i32
    return %c0_i32, %c0_i32_0 : i32, i32
  }
  func.func @transform_2(%arg0: i32) -> (i32, i32) {
    %c0_i32 = arith.constant 0 : i32
    %c0_i32_0 = arith.constant 0 : i32
    %c0_i32_1 = arith.constant 0 : i32
    return %c0_i32, %c0_i32_0 : i32, i32
  }
  func.func @transform_3(%arg0: i32) -> (i32, i32) {
    %c0_i32 = arith.constant 0 : i32
    %c0_i32_0 = arith.constant 0 : i32
    %c0_i32_1 = arith.constant 0 : i32
    return %c0_i32, %c0_i32_0 : i32, i32
  }
  func.func @transform_4(%arg0: i32) -> (i32, i32) {
    %c0_i32 = arith.constant 0 : i32
    %c0_i32_0 = arith.constant 0 : i32
    %c0_i32_1 = arith.constant 0 : i32
    return %c0_i32, %c0_i32_0 : i32, i32
  }
  func.func @transform_5(%arg0: i32) -> (i32, i32) {
    %c0_i32 = arith.constant 0 : i32
    %c0_i32_0 = arith.constant 0 : i32
    return %arg0, %c0_i32 : i32, i32
  }
}

</mosaic_0001>

<bundles_post_ra>
// kernel: mlp2_forward.1
= control target key start
LH: loop header
LB: loop body
LE: loop exit
PB: predicated region body
PF: predicated region fallthrough
CT: control target
= control target key end

     0   :  { %10 = vsyncpa [#allocation3], 0  ;;  %s613_s0 = inlined_call_operand.hbm [shape: f32[16,32], index: 0, kind: input, shape index: {}]   ;;  %s614_s1 = inlined_call_operand.hbm [shape: bf16[32,128], index: 1, kind: input, shape index: {}]   ;;  %s615_s2 = inlined_call_operand.hbm [shape: f32[1,128], index: 2, kind: input, shape index: {}]   ;;  %s616_s3 = inlined_call_operand.hbm [shape: bf16[128,128], index: 3, kind: input, shape index: {}]   ;;  %s617_s4 = inlined_call_operand.vmem [shape: f32[1,128], index: 4, kind: input, shape index: {}]   ;;  %s618_s5 = inlined_call_operand.hbm [shape: bf16[16,128], index: 5, kind: output, shape index: {}]  }
   0x1   :  { %11 = vsyncpa [#allocation6], 0 }
   0x2   :  { %12 = vsyncpa [#allocation9], 0 }
   0x3   :  { %13 = vsyncpa [#allocation4], 0  ;;  %s493_s18 = smov [#allocation5]   ;;  %s375_s22 = scalar_lea.hbm %s614_s1, 256 }
   0x4   :  { %s31_s19 = sshll.u32 %s493_s18, 4  ;;  %p376_p0 = scmp.ne.s32.totalorder %s614_s1, %s375_s22  ;;  %s32_s19 = int_to_ptr.vmem [resolvable:$true] %s31_s19 }
   0x5   :  { %p379_p1 = scmp.lt.u32.totalorder %s375_s22, %s614_s1 }
   0x7   :  { %p381_p2 = pnand %p379_p1, %p376_p0 }
   0x9   :  { %384 = shalt.err (!%p381_p2)
}
   0xa   :  { %s385_s27 = scalar_lea.vmem %s32_s19, 256  ;;  %p390_p4 = scmp.lt.s32.totalorder %s32_s19, %s32_s19 }
   0xb   :  { %p386_p3 = scmp.ne.s32.totalorder %s32_s19, %s385_s27  ;;  %p391_p5 = scmp.lt.s32.totalorder %s385_s27, %s385_s27 }
   0xd   :  { %p392_p6 = por %p391_p5, %p390_p4 }
   0xf   :  { %p393_p7 = pnand %p392_p6, %p386_p3 }
  0x11   :  { %396 = shalt.err (!%p393_p7)
}
  0x12   :  { %s494_s28 = smov 64   ;;  %s495_s29 = smov 4  }
  0x13   :  { %37 = dma.hbm_to_vmem [thread:$0]  %s614_s1, 256, %s32_s19, [#allocation6], %s494_s28, %s494_s28, %s495_s29  }
  0x14   :  { %s496_s7 = smov [#allocation2]   ;;  %s397_s11 = scalar_lea.hbm %s613_s0, 256 }
  0x15   :  { %s19_s8 = sshll.u32 %s496_s7, 4  ;;  %p398_p8 = scmp.ne.s32.totalorder %s613_s0, %s397_s11  ;;  %s20_s8 = int_to_ptr.vmem [resolvable:$true] %s19_s8 }
  0x16   :  { %p401_p9 = scmp.lt.u32.totalorder %s397_s11, %s613_s0 }
  0x18   :  { %p403_p10 = pnand %p401_p9, %p398_p8 }
  0x1a   :  { %406 = shalt.err (!%p403_p10)
}
  0x1b   :  { %s407_s16 = scalar_lea.vmem %s20_s8, 256  ;;  %p412_p12 = scmp.lt.s32.totalorder %s20_s8, %s20_s8 }
  0x1c   :  { %p408_p11 = scmp.ne.s32.totalorder %s20_s8, %s407_s16  ;;  %p413_p13 = scmp.lt.s32.totalorder %s407_s16, %s407_s16 }
  0x1e   :  { %p414_p0 = por %p413_p13, %p412_p12 }
  0x20   :  { %p415_p1 = pnand %p414_p0, %p408_p11 }
  0x22   :  { %418 = shalt.err (!%p415_p1)
}
  0x23   :  { %s497_s1 = smov 128   ;;  %s498_s17 = smov 8  }
  0x24   :  { %25 = dma.hbm_to_vmem [thread:$0]  %s613_s0, 256, %s20_s8, [#allocation3], %s497_s1, %s497_s1, %s498_s17  }
  0x25   :  { %s499_s20 = smov [#allocation7]   ;;  %s500_s22 = smov [#allocation8]  }
  0x26   :  { %s44_s21 = sshll.u32 %s499_s20, 4  ;;  %s53_s23 = sshll.u32 %s500_s22, 4  ;;  %s45_s21 = int_to_ptr.vmem [resolvable:$true] %s44_s21  ;;  %s561_s23 = int_to_ptr.vmem [resolvable:$true] %s53_s23 }
  0x27   :  { %s419_s26 = scalar_lea.hbm %s615_s2, 16 }
  0x28   :  { %p420_p2 = scmp.ne.s32.totalorder %s615_s2, %s419_s26  ;;  %p423_p3 = scmp.lt.u32.totalorder %s419_s26, %s615_s2 }
  0x2a   :  { %p425_p4 = pnand %p423_p3, %p420_p2 }
  0x2c   :  { %428 = shalt.err (!%p425_p4)
}
  0x2d   :  { %s429_s0 = scalar_lea.vmem %s45_s21, 16  ;;  %s433_s8 = scalar_lea.vmem %s45_s21, 32 }
  0x2e   :  { %p430_p5 = scmp.ne.s32.totalorder %s45_s21, %s429_s0  ;;  %p434_p6 = scmp.lt.s32.totalorder %s45_s21, %s45_s21 }
  0x2f   :  { %p435_p7 = scmp.lt.s32.totalorder %s433_s8, %s429_s0 }
  0x31   :  { %p436_p8 = por %p435_p7, %p434_p6 }
  0x33   :  { %p437_p9 = pnand %p436_p8, %p430_p5 }
  0x35   :  { %440 = shalt.err (!%p437_p9)
}
  0x36   :  { %47 = dma.hbm_to_vmem [thread:$0]  %s615_s2, 16, %s45_s21, [#allocation6]  }
  0x37   :  { %s441_s13 = scalar_lea.hbm %s616_s3, 1024 }
  0x38   :  { %p442_p10 = scmp.ne.s32.totalorder %s616_s3, %s441_s13  ;;  %p445_p11 = scmp.lt.u32.totalorder %s441_s13, %s616_s3 }
  0x3a   :  { %p447_p12 = pnand %p445_p11, %p442_p10 }
  0x3c   :  { %450 = shalt.err (!%p447_p12)
}
  0x3d   :  { %s451_s17 = scalar_lea.vmem %s561_s23, 1024  ;;  %p456_p0 = scmp.lt.s32.totalorder %s561_s23, %s561_s23 }
  0x3e   :  { %p452_p13 = scmp.ne.s32.totalorder %s561_s23, %s451_s17  ;;  %p457_p1 = scmp.lt.s32.totalorder %s451_s17, %s451_s17 }
  0x40   :  { %p458_p2 = por %p457_p1, %p456_p0 }
  0x42   :  { %p459_p3 = pnand %p458_p2, %p452_p13 }
  0x44   :  { %462 = shalt.err (!%p459_p3)
}
  0x45   :  { %59 = dma.hbm_to_vmem [thread:$0]  %s616_s3, 1024, %s561_s23, [#allocation9], %s494_s28, %s494_s28, %s495_s29  }
  0x46   :  { %485 = dma.done.wait [#allocation3], 256  }
  0x47   :  { %486 = vsyncadd [#allocation3], 4294967040 }
  0x48   :  { %487 = dma.done.wait [#allocation6], 272  }
  0x49   :  { %488 = vsyncadd [#allocation6], 4294967024 }
  0x4a   :  { %489 = dma.done.wait [#allocation9], 1024  }
  0x4b   :  { %490 = vsyncadd [#allocation9], 4294966272  ;;  %v501_v0 = vmov 0.0   ;;  %vm502_vm0 = vmmov 0   ;;  %v365_v1 = vld [vmem:[#allocation5] sm:$0xff]   ;;  %v366_v2 = vld [vmem:[#allocation5 + $0x8] sm:$0xff]  }
  0x4c   :  { %326 = vmatprep.subr.bf16.mxu0 %v501_v0  ;;  %330 = vmatprep.mubr.msk.bf16.mxu0 %vm502_vm0, %v501_v0  ;;  %v75_v3 = vld [vmem:[#allocation2] sm:$0xff]  ;;  %v76_v4 = vld [vmem:[#allocation2 + $0x8] sm:$0xff]  ;;  %vm101_vm1 = vcmask 261120   ;;  %v369_v8 = vld [vmem:[#allocation8 + $0x10] sm:$0xff]   ;;  %s503_s20 = smov [#allocation10]  }
  0x4d   :  { %334 = vmatprep.subr.bf16.mxu1 %v501_v0  ;;  %350 = vmatprep.mubr.msk.bf16.mxu1 %vm502_vm0, %v501_v0  ;;  %v367_v5 = vld [vmem:[#allocation8] sm:$0xff]   ;;  %v77_v6 = vpack.c.bf16 %v76_v4, %v75_v3  ;;  %v368_v7 = vld [vmem:[#allocation8 + $0x8] sm:$0xff]   ;;  %v370_v9 = vld [vmem:[#allocation8 + $0x18] sm:$0xff]   ;;  %s278_s21 = sshll.u32 %s503_s20, 4  ;;  %s279_s21 = int_to_ptr.vmem [resolvable:$true] %s278_s21 }
  0x4e   :  { %327 = vmatpush3.bf16.msra.mxu0 %v365_v1  ;;  %335 = vmatpush3.bf16.msra.mxu1 %v367_v5  ;;  %v371_v10 = vld [vmem:[#allocation8 + $0x20] sm:$0xff]   ;;  %v372_v11 = vld [vmem:[#allocation8 + $0x28] sm:$0xff]   ;;  %v373_v12 = vld [vmem:[#allocation8 + $0x30] sm:$0xff]   ;;  %s463_s22 = scalar_lea.vmem %s279_s21, 128  ;;  %p468_p5 = scmp.lt.s32.totalorder %s279_s21, %s279_s21 }
  0x4f   :  { %328 = vmatprep.subr.bf16.mxu0 %v501_v0  ;;  %336 = vmatprep.subr.bf16.mxu1 %v501_v0  ;;  %v374_v13 = vld [vmem:[#allocation8 + $0x38] sm:$0xff]   ;;  %p464_p4 = scmp.ne.s32.totalorder %s279_s21, %s463_s22  ;;  %p469_p6 = scmp.lt.s32.totalorder %s463_s22, %s463_s22 }
  0x50   :  { %v292_v14 = vld [vmem:[#allocation7] ss:$0 sm:$0xff] }
  0x51   :  { %v296_v24 = vld [vmem:[%s617_s4] ss:$0 sm:$0xff]  ;;  %p470_p7 = por %p469_p6, %p468_p5 }
  0x52   :  { %329 = vmatpush3.bf16.msra.mxu0 %v366_v2  ;;  %337 = vmatpush3.bf16.msra.mxu1 %v368_v7 }
  0x53   :  { %338 = vmatprep.subr.bf16.mxu1 %v501_v0  ;;  %p471_p8 = pnand %p470_p7, %p464_p4 }
  0x55   :  { %331 = vmatmul.mubr.msk.bf16.vlgmr.msra.gmra.mrb[0].mxu0 %vm101_vm1, %v77_v6 }
  0x56   :  { %339 = vmatpush3.bf16.msra.mxu1 %v369_v8 }
  0x57   :  { %340 = vmatprep.subr.bf16.mxu1 %v501_v0 }
  0x5a   :  { %341 = vmatpush3.bf16.msra.mxu1 %v370_v9 }
  0x5b   :  { %342 = vmatprep.subr.bf16.mxu1 %v501_v0 }
  0x5e   :  { %343 = vmatpush3.bf16.msra.mxu1 %v371_v10 }
  0x5f   :  { %344 = vmatprep.subr.bf16.mxu1 %v501_v0 }
  0x62   :  { %345 = vmatpush3.bf16.msra.mxu1 %v372_v11 }
  0x63   :  { %346 = vmatprep.subr.bf16.mxu1 %v501_v0 }
  0x66   :  { %347 = vmatpush3.bf16.msra.mxu1 %v373_v12 }
  0x67   :  { %348 = vmatprep.subr.bf16.mxu1 %v501_v0 }
  0x6a   :  { %349 = vmatpush3.bf16.msra.mxu1 %v374_v13 }
 0x128   :  { %v139_v15 = vpop.f32.mrb[0].mxu0 }
 0x129   :  { %v140_v16 = vadd.f32 %v292_v14, %v139_v15  ;;  %v332_v17 = vpop.f32.mrb[1].mxu0 }
 0x12a   :  { %v142_v18 = vpop.f32.mrb[2].mxu0 }
 0x12b   :  { %v143_v19 = vadd.f32 %v292_v14, %v142_v18  ;;  %v333_v20 = vpop.f32.mrb[3].mxu0  ;;  %v146_v21 = vmax.f32 %v140_v16, 0.0 }
 0x12d   :  { %v147_v22 = vmax.f32 %v143_v19, 0.0 }
 0x12f   :  { %v148_v23 = vpack.c.bf16 %v147_v22, %v146_v21 }
 0x131   :  { %351 = vmatmul.mubr.bf16.vlgmr.msra.gmra.mrb[0].mxu1 %v148_v23 }
 0x204   :  { %v254_v25 = vpop.f32.mrb[0].mxu1 }
 0x205   :  { %v255_v26 = vadd.f32 %v296_v24, %v254_v25  ;;  %v352_v27 = vpop.f32.mrb[1].mxu1 }
 0x206   :  { %v257_v28 = vpop.f32.mrb[2].mxu1 }
 0x207   :  { %v258_v29 = vadd.f32 %v296_v24, %v257_v28  ;;  %v353_v30 = vpop.f32.mrb[3].mxu1  ;;  %v261_v31 = vmax.f32 %v255_v26, 0.0 }
 0x209   :  { %v262_v32 = vmax.f32 %v258_v29, 0.0 }
 0x20b   :  { %v312_v33 = vpack.c.bf16 %v262_v32, %v261_v31 }
 0x20d   :  { %313 = vst [vmem:[#allocation10] sm:$0xff] %v312_v33  }
 0x20e   :  { %474 = shalt.err (!%p471_p8)
}
 0x20f   :  { %s475_s24 = scalar_lea.hbm %s618_s5, 128 }
 0x210   :  { %p476_p9 = scmp.ne.s32.totalorder %s618_s5, %s475_s24  ;;  %p479_p10 = scmp.lt.u32.totalorder %s475_s24, %s618_s5 }
 0x212   :  { %p481_p11 = pnand %p479_p10, %p476_p9 }
 0x214   :  { %484 = shalt.err (!%p481_p11)
}
 0x215   :  { %284 = dma.vmem_to_hbm [thread:$0]  %s279_s21, 128, %s618_s5, [#allocation4], %s494_s28, %s494_s28, %s495_s29  }
 0x216   :  { %491 = dma.done.wait [#allocation4], 128  }
 0x217   :  { %492 = vsyncadd [#allocation4], 4294967168 }
 0x218   :  { %288 = vsyncpa [#allocation3], 1 }
 0x219   :  { %289 = vsyncpa [#allocation6], 1 }
 0x21a   :  { %290 = vsyncpa [#allocation9], 1 }
 0x21b   :  { %291 = vsyncpa [#allocation4], 1 }

</bundles_post_ra>
